<compile_context>
chip_gen: v7x
topology: tpu7x:2x2x1
jax: 0.10.0
libtpu: 0.0.40
codegen_flags: <defaults>
</compile_context>

<pallas_src>
import math

import jax
import jax.numpy as jnp
from jax import lax
from jax.experimental import pallas as pl
from jax.experimental.pallas import tpu as pltpu

_MiB = 1024 * 1024


def _round_up(n, m):
    return ((n + m - 1) // m) * m


def _vmem_capacity_bytes():
    try:
        return int(pltpu.get_tpu_info().vmem_capacity_bytes)
    except Exception:
        return 128 * _MiB  # conservative fallback (v5e/v6e physical)


def _vmem_footprint_bytes(tm, D, H, w_itemsize, x_itemsize, out_itemsize):
    """Rough per-call VMEM footprint for a row tile of size tm."""
    xin = 2 * tm * D * x_itemsize            # x tile, double-buffered
    yout = 2 * tm * D * out_itemsize         # out tile, double-buffered
    weights = 2 * D * H * w_itemsize         # W1 + W2, single-buffered
    smalls = (3 * D + H) * 4 * 2             # gamma/beta/b1/b2 (+ slack)
    # live intermediates: xn (f32 + cast), h (f32 + cast)
    inter = tm * D * (4 + w_itemsize) + tm * H * (4 + w_itemsize)
    return xin + yout + weights + smalls + inter


def _ffn_kernel(x_ref, g_ref, be_ref, w1_ref, b1_ref, w2_ref, b2_ref, o_ref):
    # One tile of token rows; full feature dims (D, H) are resident in VMEM.
    x = x_ref[...].astype(jnp.float32)                          # (tm, D)

    # ---- LayerNorm over last dim (eps = 1e-5, PyTorch default) ----
    # Two-pass variance (robust to |mean| >> std, matches PyTorch behaviour).
    mu = jnp.mean(x, axis=-1, keepdims=True)
    xc = x - mu
    var = jnp.mean(xc * xc, axis=-1, keepdims=True)
    xn = xc * lax.rsqrt(var + 1e-5)
    xn = xn * g_ref[...].astype(jnp.float32) + be_ref[...].astype(jnp.float32)

    # ---- Linear(dim -> hidden): MXU-dtype operands, f32 accumulation ----
    h = jnp.dot(xn.astype(w1_ref.dtype), w1_ref[...],
                preferred_element_type=jnp.float32)             # (tm, H) f32
    h = h + b1_ref[...].astype(jnp.float32)

    # ---- GELU (exact erf variant, PyTorch nn.GELU default), f32 path ----
    h = 0.5 * h * (1.0 + lax.erf(h * (1.0 / math.sqrt(2.0))))

    # ---- Linear(hidden -> dim): MXU-dtype operands, f32 accumulation ----
    y = jnp.dot(h.astype(w2_ref.dtype), w2_ref[...],
                preferred_element_type=jnp.float32)             # (tm, D) f32
    y = y + b2_ref[...].astype(jnp.float32)

    o_ref[...] = y.astype(o_ref.dtype)


def feedforward_pallas(x, gamma, beta, w1, b1, w2, b2, *, tm=512,
                       matmul_dtype=jnp.bfloat16, out_dtype=None):
    """x: (B, S, D).  Returns (B, S, D).

    matmul_dtype: dtype of the MXU operands (bf16 default; pass jnp.float32
      for exact PyTorch-fp32-Linear parity).
    out_dtype: output dtype (default: x.dtype).  bf16 halves store traffic.
    """
    B, S, D = x.shape
    H = w1.shape[1]
    N = B * S
    out_dtype = x.dtype if out_dtype is None else out_dtype

    w_itemsize = jnp.dtype(matmul_dtype).itemsize
    x_itemsize = jnp.dtype(x.dtype).itemsize
    out_itemsize = jnp.dtype(out_dtype).itemsize

    # ---- Generation-aware VMEM budget (leave headroom for Mosaic scratch) --
    cap = _vmem_capacity_bytes()
    vmem_limit = max(32 * _MiB, min(cap - 16 * _MiB, 100 * _MiB))
    # v7x (64 MiB/TC) -> 48 MiB; v5e/v6e (128 MiB) -> 100 MiB.

    # ---- Row tile: multiple of 8 sublanes, >=2 grid steps when possible ----
    if N <= 8:
        tm_eff = N                       # single tile; block == full dim
    else:
        half = _round_up(pl.cdiv(N, 2), 8)   # keep >=2 steps (v7x 2 TCs)
        tm_eff = min(_round_up(tm, 8), half)
        # shrink tile until the rough footprint fits the VMEM budget
        while (tm_eff > 64 and
               _vmem_footprint_bytes(tm_eff, D, H, w_itemsize,
                                     x_itemsize, out_itemsize)
               > int(0.9 * vmem_limit)):
            tm_eff = max(64, _round_up(tm_eff // 2, 8))
    grid_m = pl.cdiv(N, tm_eff)          # ragged last tile handled by Pallas

    x2 = x.reshape(N, D)

    gamma2 = gamma.reshape(1, D).astype(jnp.float32)
    beta2 = beta.reshape(1, D).astype(jnp.float32)
    b1_2 = b1.reshape(1, H).astype(jnp.float32)
    b2_2 = b2.reshape(1, D).astype(jnp.float32)

    # MXU-native weight storage (halves weight VMEM + HBM traffic for bf16).
    w1c = w1.astype(matmul_dtype)
    w2c = w2.astype(matmul_dtype)

    cost = pl.CostEstimate(
        flops=4 * N * D * H + 8 * N * D,
        transcendentals=N * H + N,                     # erf per element + rsqrt per row
        bytes_accessed=(N * D * x_itemsize             # x in
                        + N * D * out_itemsize         # y out
                        + 2 * D * H * w_itemsize       # W1 + W2 (fetched once)
                        + (3 * D + H) * 4),            # gamma/beta/b1/b2
    )

    resident = pl.Buffered(1)  # constant-index_map blocks: no double buffer

    out = pl.pallas_call(
        _ffn_kernel,
        out_shape=jax.ShapeDtypeStruct((N, D), out_dtype),
        grid_spec=pltpu.PrefetchScalarGridSpec(
            num_scalar_prefetch=0,
            grid=(grid_m,),
            in_specs=[
                pl.BlockSpec((tm_eff, D), lambda i: (i, 0)),   # x row tile
                pl.BlockSpec((1, D), lambda i: (0, 0),
                             pipeline_mode=resident),          # gamma
                pl.BlockSpec((1, D), lambda i: (0, 0),
                             pipeline_mode=resident),          # beta
                pl.BlockSpec((D, H), lambda i: (0, 0),
                             pipeline_mode=resident),          # W1
                pl.BlockSpec((1, H), lambda i: (0, 0),
                             pipeline_mode=resident),          # b1
                pl.BlockSpec((H, D), lambda i: (0, 0),
                             pipeline_mode=resident),          # W2
                pl.BlockSpec((1, D), lambda i: (0, 0),
                             pipeline_mode=resident),          # b2
            ],
            out_specs=pl.BlockSpec((tm_eff, D), lambda i: (i, 0)),
        ),
        compiler_params=pltpu.CompilerParams(
            dimension_semantics=("parallel",),
            vmem_limit_bytes=int(vmem_limit),
        ),
        cost_estimate=cost,
    )(x2, gamma2, beta2, w1c, b1_2, w2c, b2_2)

    return out.reshape(B, S, D)


def _reference(x, gamma, beta, w1, b1, w2, b2):
    mu = jnp.mean(x, axis=-1, keepdims=True)
    var = jnp.mean((x - mu) ** 2, axis=-1, keepdims=True)
    xn = (x - mu) / jnp.sqrt(var + 1e-5) * gamma + beta
    h = xn @ w1 + b1
    h = 0.5 * h * (1.0 + lax.erf(h / math.sqrt(2.0)))
    return h @ w2 + b2


if __name__ == "__main__":
    # Small shapes consistent with the module; D/H multiples of 128 exercise
    # the (8,128) lane tiling while staying tiny (N = B*S = 16 token rows,
    # so the kernel runs with 2 grid steps of 8 rows each).
    B, S, D, Hdim = 2, 8, 128, 256

    key = jax.random.PRNGKey(0)
    kx, kw1, kb1, kw2, kb2 = jax.random.split(key, 5)

    x = jax.random.normal(kx, (B, S, D), dtype=jnp.float32)

    # Deterministic parameter init (PyTorch-like uniform bounds, synthetic).
    gamma = jnp.ones((D,), jnp.float32)
    beta = jnp.zeros((D,), jnp.float32)
    lim1 = 1.0 / math.sqrt(D)
    w1 = jax.random.uniform(kw1, (D, Hdim), jnp.float32, -lim1, lim1)
    b1 = jax.random.uniform(kb1, (Hdim,), jnp.float32, -lim1, lim1)
    lim2 = 1.0 / math.sqrt(Hdim)
    w2 = jax.random.uniform(kw2, (Hdim, D), jnp.float32, -lim2, lim2)
    b2 = jax.random.uniform(kb2, (D,), jnp.float32, -lim2, lim2)

    out = feedforward_pallas(x, gamma, beta, w1, b1, w2, b2)
    out = jax.block_until_ready(out)

    ref = _reference(x, gamma, beta, w1, b1, w2, b2)
    assert out.shape == (B, S, D)
    # bf16 MXU operands (f32 accumulation) -> loosened tolerance vs. pure f32.
    assert jnp.allclose(out, ref, atol=2e-2, rtol=2e-2), "mismatch vs reference"

    print("KERNEL_OK")
</pallas_src>

<mosaic_0001>
module attributes {stable_mosaic.version = 11 : i64} {
  func.func @_ffn_kernel(%arg0: i32, %arg1: memref<8x128xf32, #tpu.memory_space<vmem>>, %arg2: memref<1x128xf32, #tpu.memory_space<vmem>>, %arg3: memref<1x128xf32, #tpu.memory_space<vmem>>, %arg4: memref<128x256xbf16, #tpu.memory_space<vmem>>, %arg5: memref<1x256xf32, #tpu.memory_space<vmem>>, %arg6: memref<256x128xbf16, #tpu.memory_space<vmem>>, %arg7: memref<1x128xf32, #tpu.memory_space<vmem>>, %arg8: memref<8x128xf32, #tpu.memory_space<vmem>>) attributes {dimension_semantics = [#tpu.dimension_semantics<parallel>], iteration_bounds = array<i64: 2>, scalar_prefetch = 0 : i64, scratch_operands = 0 : i64, tpu.core_type = #tpu.core_type<tc>, window_params = [{transform_indices = @transform_0, window_bounds = array<i64: 8, 128>}, {pipeline_mode = #tpu.pipeline_mode<synchronous>, transform_indices = @transform_1, window_bounds = array<i64: 1, 128>}, {pipeline_mode = #tpu.pipeline_mode<synchronous>, transform_indices = @transform_2, window_bounds = array<i64: 1, 128>}, {pipeline_mode = #tpu.pipeline_mode<synchronous>, transform_indices = @transform_3, window_bounds = array<i64: 128, 256>}, {pipeline_mode = #tpu.pipeline_mode<synchronous>, transform_indices = @transform_4, window_bounds = array<i64: 1, 256>}, {pipeline_mode = #tpu.pipeline_mode<synchronous>, transform_indices = @transform_5, window_bounds = array<i64: 256, 128>}, {pipeline_mode = #tpu.pipeline_mode<synchronous>, transform_indices = @transform_6, window_bounds = array<i64: 1, 128>}, {transform_indices = @transform_7, window_bounds = array<i64: 8, 128>}]} {
    %c0 = arith.constant 0 : index
    %c0_0 = arith.constant 0 : index
    %0 = vector.load %arg1[%c0, %c0_0] : memref<8x128xf32, #tpu.memory_space<vmem>>, vector<8x128xf32>
    %cst = arith.constant dense<0.000000e+00> : vector<8xf32>
    %1 = vector.multi_reduction <add>, %0, %cst [1] : vector<8x128xf32> to vector<8xf32>
    %2 = vector.shape_cast %1 : vector<8xf32> to vector<8x1xf32>
    %cst_1 = arith.constant 1.280000e+02 : f32
    %3 = vector.broadcast %cst_1 : f32 to vector<8x1xf32>
    %4 = arith.divf %2, %3 : vector<8x1xf32>
    %5 = vector.broadcast %4 : vector<8x1xf32> to vector<8x128xf32>
    %6 = arith.subf %0, %5 : vector<8x128xf32>
    %7 = arith.mulf %6, %6 : vector<8x128xf32>
    %cst_2 = arith.constant dense<0.000000e+00> : vector<8xf32>
    %8 = vector.multi_reduction <add>, %7, %cst_2 [1] : vector<8x128xf32> to vector<8xf32>
    %9 = vector.shape_cast %8 : vector<8xf32> to vector<8x1xf32>
    %cst_3 = arith.constant 1.280000e+02 : f32
    %10 = vector.broadcast %cst_3 : f32 to vector<8x1xf32>
    %11 = arith.divf %9, %10 : vector<8x1xf32>
    %cst_4 = arith.constant 9.99999974E-6 : f32
    %12 = vector.broadcast %cst_4 : f32 to vector<8x1xf32>
    %13 = arith.addf %11, %12 : vector<8x1xf32>
    %14 = math.rsqrt %13 : vector<8x1xf32>
    %15 = vector.broadcast %14 : vector<8x1xf32> to vector<8x128xf32>
    %16 = arith.mulf %6, %15 : vector<8x128xf32>
    %c0_5 = arith.constant 0 : index
    %c0_6 = arith.constant 0 : index
    %17 = vector.load %arg2[%c0_5, %c0_6] : memref<1x128xf32, #tpu.memory_space<vmem>>, vector<1x128xf32>
    %18 = vector.broadcast %17 : vector<1x128xf32> to vector<8x128xf32>
    %19 = arith.mulf %16, %18 : vector<8x128xf32>
    %c0_7 = arith.constant 0 : index
    %c0_8 = arith.constant 0 : index
    %20 = vector.load %arg3[%c0_7, %c0_8] : memref<1x128xf32, #tpu.memory_space<vmem>>, vector<1x128xf32>
    %21 = vector.broadcast %20 : vector<1x128xf32> to vector<8x128xf32>
    %22 = arith.addf %19, %21 : vector<8x128xf32>
    %23 = arith.truncf %22 : vector<8x128xf32> to vector<8x128xbf16>
    %c0_9 = arith.constant 0 : index
    %c0_10 = arith.constant 0 : index
    %24 = vector.load %arg4[%c0_9, %c0_10] : memref<128x256xbf16, #tpu.memory_space<vmem>>, vector<128x256xbf16>
    %cst_11 = arith.constant dense<0.000000e+00> : vector<8x256xf32>
    %25 = tpu.matmul %23, %24, %cst_11 {dimension_numbers = #tpu.dot_dimension_numbers<[1], [0], [0], [1], [0, 0, 1, 1], [], []>} : vector<8x128xbf16>, vector<128x256xbf16>, vector<8x256xf32> -> vector<8x256xf32>
    %c0_12 = arith.constant 0 : index
    %c0_13 = arith.constant 0 : index
    %26 = vector.load %arg5[%c0_12, %c0_13] : memref<1x256xf32, #tpu.memory_space<vmem>>, vector<1x256xf32>
    %27 = vector.broadcast %26 : vector<1x256xf32> to vector<8x256xf32>
    %28 = arith.addf %25, %27 : vector<8x256xf32>
    %cst_14 = arith.constant 5.000000e-01 : f32
    %29 = vector.broadcast %cst_14 : f32 to vector<8x256xf32>
    %30 = arith.mulf %29, %28 : vector<8x256xf32>
    %cst_15 = arith.constant 0.707106769 : f32
    %31 = vector.broadcast %cst_15 : f32 to vector<8x256xf32>
    %32 = arith.mulf %28, %31 : vector<8x256xf32>
    %33 = math.erf %32 : vector<8x256xf32>
    %cst_16 = arith.constant 1.000000e+00 : f32
    %34 = vector.broadcast %cst_16 : f32 to vector<8x256xf32>
    %35 = arith.addf %34, %33 : vector<8x256xf32>
    %36 = arith.mulf %30, %35 : vector<8x256xf32>
    %37 = arith.truncf %36 : vector<8x256xf32> to vector<8x256xbf16>
    %c0_17 = arith.constant 0 : index
    %c0_18 = arith.constant 0 : index
    %38 = vector.load %arg6[%c0_17, %c0_18] : memref<256x128xbf16, #tpu.memory_space<vmem>>, vector<256x128xbf16>
    %cst_19 = arith.constant dense<0.000000e+00> : vector<8x128xf32>
    %39 = tpu.matmul %37, %38, %cst_19 {dimension_numbers = #tpu.dot_dimension_numbers<[1], [0], [0], [1], [0, 0, 1, 1], [], []>} : vector<8x256xbf16>, vector<256x128xbf16>, vector<8x128xf32> -> vector<8x128xf32>
    %c0_20 = arith.constant 0 : index
    %c0_21 = arith.constant 0 : index
    %40 = vector.load %arg7[%c0_20, %c0_21] : memref<1x128xf32, #tpu.memory_space<vmem>>, vector<1x128xf32>
    %41 = vector.broadcast %40 : vector<1x128xf32> to vector<8x128xf32>
    %42 = arith.addf %39, %41 : vector<8x128xf32>
    %c0_22 = arith.constant 0 : index
    %c0_23 = arith.constant 0 : index
    %43 = vector.load %arg8[%c0_22, %c0_23] : memref<8x128xf32, #tpu.memory_space<vmem>>, vector<8x128xf32>
    tpu.vector_store %arg8[%c0_22, %c0_23], %42 {strides = array<i32>} : memref<8x128xf32, #tpu.memory_space<vmem>>, vector<8x128xf32>,
    return
  }
  func.func @transform_0(%arg0: i32) -> (i32, i32) {
    %c0_i32 = arith.constant 0 : i32
    %c0_i32_0 = arith.constant 0 : i32
    return %arg0, %c0_i32 : i32, i32
  }
  func.func @transform_1(%arg0: i32) -> (i32, i32) {
    %c0_i32 = arith.constant 0 : i32
    %c0_i32_0 = arith.constant 0 : i32
    %c0_i32_1 = arith.constant 0 : i32
    return %c0_i32, %c0_i32_0 : i32, i32
  }
  func.func @transform_2(%arg0: i32) -> (i32, i32) {
    %c0_i32 = arith.constant 0 : i32
    %c0_i32_0 = arith.constant 0 : i32
    %c0_i32_1 = arith.constant 0 : i32
    return %c0_i32, %c0_i32_0 : i32, i32
  }
  func.func @transform_3(%arg0: i32) -> (i32, i32) {
    %c0_i32 = arith.constant 0 : i32
    %c0_i32_0 = arith.constant 0 : i32
    %c0_i32_1 = arith.constant 0 : i32
    return %c0_i32, %c0_i32_0 : i32, i32
  }
  func.func @transform_4(%arg0: i32) -> (i32, i32) {
    %c0_i32 = arith.constant 0 : i32
    %c0_i32_0 = arith.constant 0 : i32
    %c0_i32_1 = arith.constant 0 : i32
    return %c0_i32, %c0_i32_0 : i32, i32
  }
  func.func @transform_5(%arg0: i32) -> (i32, i32) {
    %c0_i32 = arith.constant 0 : i32
    %c0_i32_0 = arith.constant 0 : i32
    %c0_i32_1 = arith.constant 0 : i32
    return %c0_i32, %c0_i32_0 : i32, i32
  }
  func.func @transform_6(%arg0: i32) -> (i32, i32) {
    %c0_i32 = arith.constant 0 : i32
    %c0_i32_0 = arith.constant 0 : i32
    %c0_i32_1 = arith.constant 0 : i32
    return %c0_i32, %c0_i32_0 : i32, i32
  }
  func.func @transform_7(%arg0: i32) -> (i32, i32) {
    %c0_i32 = arith.constant 0 : i32
    %c0_i32_0 = arith.constant 0 : i32
    return %arg0, %c0_i32 : i32, i32
  }
}

</mosaic_0001>

<bundles_post_ra>
// kernel: tpu_custom_call.1
= control target key start
LH: loop header
LB: loop body
LE: loop exit
PB: predicated region body
PF: predicated region fallthrough
CT: control target
= control target key end

     0   :  { %s1777_s0 = inlined_call_operand.hbm [shape: f32[16,128], index: 0, kind: input, shape index: {}]   ;;  %s1778_s1 = inlined_call_operand.hbm [shape: f32[1,128], index: 1, kind: input, shape index: {}]   ;;  %s1779_s2 = inlined_call_operand.hbm [shape: f32[1,128], index: 2, kind: input, shape index: {}]   ;;  %s1780_s3 = inlined_call_operand.hbm [shape: bf16[128,256], index: 3, kind: input, shape index: {}]   ;;  %s1781_s4 = inlined_call_operand.hbm [shape: f32[1,256], index: 4, kind: input, shape index: {}]   ;;  %s1782_s5 = inlined_call_operand.hbm [shape: bf16[256,128], index: 5, kind: input, shape index: {}]   ;;  %s1783_s6 = inlined_call_operand.hbm [shape: f32[1,128], index: 6, kind: input, shape index: {}]   ;;  %s1784_s7 = inlined_call_operand.hbm [shape: f32[16,128], index: 7, kind: output, shape index: {}]  }
   0x1   :  { %1788 = sst [smem:[#allocation20_spill]] %s1778_s1 }
   0x2   :  { %12 = vsyncpa [#allocation3], 0 }
   0x3   :  { %14 = vsyncpa [#allocation3 + $0x1], 0 }
   0x4   :  { %15 = vsyncpa [#allocation6], 0 }
   0x5   :  { %16 = vsyncpa [#allocation9], 0 }
   0x6   :  { %17 = vsyncpa [#allocation12], 0 }
   0x7   :  { %18 = vsyncpa [#allocation4], 0 }
   0x8   :  { %20 = vsyncpa [#allocation4 + $0x1], 0  ;;  %s1452_s24 = smov 0   ;;  %s1454_s25 = smov 0  }
   0x9   :  { %s1456_s26 = smov 0   ;;  %s1458_s27 = smov 0  }
   0xa LB: > { %s1399_s28 = smov [#allocation5]   ;;  %s1473_s30 = sadd.s32 4294967295, %s1397_s27   ;;  %s1397_s27 = sphi %s1458_s27, %s1812_s27   ;;  %s1393_s26 = sphi %s1456_s26, %s1811_s26   ;;  %s1389_s25 = sphi %s1454_s25, %s1810_s25   ;;  %s1385_s24 = sphi %s1452_s24, %s1809_s24  }
   0xb   : > { %s222_s29 = sshll.u32 %s1399_s28, 4  ;;  %p883_p0 = scmp.ge.s32.totalorder %s1397_s27, 1  ;;  %s1478_s29 = int_to_ptr.vmem [resolvable:$true] %s222_s29 }
   0xc   : > { %p1785_p1 = scmp.eq.s32.totalorder %s1473_s30, 0  ;;  %p209_p2 = scmp.lt.s32.totalorder %s1397_s27, 3 }
   0xd   : > { %s1400_s9 = smov [#allocation8]   ;;  %s1401_s12 = smov [#allocation11]  }
   0xe   : > { %p1480_p3 = pnand %p883_p0, %p209_p2  ;;  %s243_s10 = sshll.u32 %s1400_s9, 4  ;;  %s1487_s10 = int_to_ptr.vmem [resolvable:$true] %s243_s10 }
   0xf   : > { %s267_s13 = sshll.u32 %s1401_s12, 4  ;;  %s1791_s1 = sld [smem:[#allocation20_spill]]  ;;  %s1495_s13 = int_to_ptr.vmem [resolvable:$true] %s267_s13 }
  0x10   : > { %s1789_s8 = scalar_select %p1480_p3, 1, 0 }
  0x11   : > { %p991_p5 = pneg %p1480_p3 }
  0x13   : > { %p1491_p6 = pnand %p991_p5, %p1785_p1 }
  0x15   : > { %s1121_s16 = scalar_lea.hbm %s1791_s1, 16  ;;  %p1505_p8 = pneg %p1491_p6 }
  0x16   : > { %p1122_p7 = scmp.ne.s32.totalorder %s1791_s1, %s1121_s16  ;;  %p1128_p11 = scmp.lt.u32.totalorder %s1121_s16, %s1791_s1 }
  0x18   : > { %p1124_p9 = pnand %p1505_p8, %p1122_p7 }
  0x1a   : > { %p1125_p10 = pneg %p1124_p9 }
  0x1c   : > { %p1130_p12 = pnand %p1128_p11, %p1125_p10 }
  0x1e   : > { %1133 = shalt.err (!%p1130_p12)
}
  0x1f   : > { %s1134_s22 = scalar_lea.vmem %s1478_s29, 16  ;;  %s1141_s23 = scalar_lea.vmem %s1478_s29, 32 }
  0x20   : > { %p1135_p13 = scmp.ne.s32.totalorder %s1478_s29, %s1134_s22  ;;  %p1142_p5 = scmp.lt.s32.totalorder %s1478_s29, %s1478_s29 }
  0x21   : > { %p1143_p7 = scmp.lt.s32.totalorder %s1141_s23, %s1134_s22 }
  0x22   : > { %p1137_p0 = pnand %p1135_p13, %p1505_p8 }
  0x23   : > { %p1144_p9 = por %p1143_p7, %p1142_p5 }
  0x24   : > { %p1138_p2 = pneg %p1137_p0 }
  0x26   : > { %p1145_p4 = pnand %p1144_p9, %p1138_p2 }
  0x28   : > { %1148 = shalt.err (!%p1145_p4)
}
  0x29   : > { %994 = dma.hbm_to_vmem [thread:$0]  (!%p1491_p6), %s1791_s1, 16, %s1478_s29, [#allocation6]  }
  0x2a   : > { %s1149_s15 = scalar_lea.hbm %s1780_s3, 2048 }
  0x2b   : > { %p1150_p10 = scmp.ne.s32.totalorder %s1780_s3, %s1149_s15  ;;  %p1156_p4 = scmp.lt.u32.totalorder %s1149_s15, %s1780_s3 }
  0x2d   : > { %p1152_p11 = pnand %p1150_p10, %p1505_p8 }
  0x2f   : > { %p1153_p12 = pneg %p1152_p11 }
  0x31   : > { %p1158_p13 = pnand %p1156_p4, %p1153_p12 }
  0x33   : > { %1161 = shalt.err (!%p1158_p13)
}
  0x34   : > { %s1162_s29 = scalar_lea.vmem %s1487_s10, 2048  ;;  %p1170_p7 = scmp.lt.s32.totalorder %s1487_s10, %s1487_s10 }
  0x35   : > { %p1163_p0 = scmp.ne.s32.totalorder %s1487_s10, %s1162_s29  ;;  %p1171_p9 = scmp.lt.s32.totalorder %s1162_s29, %s1162_s29 }
  0x37   : > { %p1165_p2 = pnand %p1163_p0, %p1505_p8  ;;  %p1172_p10 = por %p1171_p9, %p1170_p7 }
  0x39   : > { %p1166_p5 = pneg %p1165_p2 }
  0x3b   : > { %p1173_p11 = pnand %p1172_p10, %p1166_p5 }
  0x3d   : > { %1176 = shalt.err (!%p1173_p11)
}
  0x3e   : > { %s1402_s21 = smov 128   ;;  %s1403_s22 = smov 8  }
  0x3f   : > { %1000 = dma.hbm_to_vmem [thread:$0]  (!%p1491_p6), %s1780_s3, 2048, %s1487_s10, [#allocation9], %s1402_s21, %s1402_s21, %s1403_s22  }
  0x40   : > { %s1177_s14 = scalar_lea.hbm %s1782_s5, 2048 }
  0x41   : > { %p1178_p12 = scmp.ne.s32.totalorder %s1782_s5, %s1177_s14  ;;  %p1184_p0 = scmp.lt.u32.totalorder %s1177_s14, %s1782_s5 }
  0x43   : > { %p1180_p4 = pnand %p1178_p12, %p1505_p8 }
  0x45   : > { %p1181_p13 = pneg %p1180_p4 }
  0x47   : > { %p1186_p2 = pnand %p1184_p0, %p1181_p13 }
  0x49   : > { %1189 = shalt.err (!%p1186_p2)
}
  0x4a   : > { %s1190_s10 = scalar_lea.vmem %s1495_s13, 2048  ;;  %p1198_p10 = scmp.lt.s32.totalorder %s1495_s13, %s1495_s13 }
  0x4b   : > { %p1191_p5 = scmp.ne.s32.totalorder %s1495_s13, %s1190_s10  ;;  %p1199_p11 = scmp.lt.s32.totalorder %s1190_s10, %s1190_s10 }
  0x4d   : > { %p1193_p7 = pnand %p1191_p5, %p1505_p8  ;;  %p1200_p12 = por %p1199_p11, %p1198_p10 }
  0x4f   : > { %p1194_p9 = pneg %p1193_p7 }
  0x51   : > { %p1201_p4 = pnand %p1200_p12, %p1194_p9 }
  0x53   : > { %1204 = shalt.err (!%p1201_p4)
}
  0x54   : > { %s1404_s20 = smov 64   ;;  %s1405_s29 = smov 4  }
  0x55   : > { %1006 = dma.hbm_to_vmem [thread:$0]  (!%p1491_p6), %s1782_s5, 2048, %s1495_s13, [#allocation12], %s1404_s20, %s1404_s20, %s1405_s29  }
  0x56   : > { %s1406_s23 = smov [#allocation7]   ;;  %s1407_s9 = smov [#allocation10]  }
  0x57   : > { %s233_s28 = sshll.u32 %s1406_s23, 4  ;;  %s257_s12 = sshll.u32 %s1407_s9, 4  ;;  %s234_s28 = int_to_ptr.vmem [resolvable:$true] %s233_s28  ;;  %s258_s12 = int_to_ptr.vmem [resolvable:$true] %s257_s12 }
  0x58   : > { %s1205_s16 = scalar_lea.hbm %s1779_s2, 16 }
  0x59   : > { %p1206_p13 = scmp.ne.s32.totalorder %s1779_s2, %s1205_s16  ;;  %p1212_p5 = scmp.lt.u32.totalorder %s1205_s16, %s1779_s2 }
  0x5b   : > { %p1208_p0 = pnand %p1206_p13, %p1505_p8 }
  0x5d   : > { %p1209_p2 = pneg %p1208_p0 }
  0x5f   : > { %p1214_p7 = pnand %p1212_p5, %p1209_p2 }
  0x61   : > { %1217 = shalt.err (!%p1214_p7)
}
  0x62   : > { %s1218_s13 = scalar_lea.vmem %s234_s28, 16  ;;  %s1225_s20 = scalar_lea.vmem %s234_s28, 32 }
  0x63   : > { %p1219_p9 = scmp.ne.s32.totalorder %s234_s28, %s1218_s13  ;;  %p1226_p12 = scmp.lt.s32.totalorder %s234_s28, %s234_s28 }
  0x64   : > { %p1227_p4 = scmp.lt.s32.totalorder %s1225_s20, %s1218_s13 }
  0x65   : > { %p1221_p10 = pnand %p1219_p9, %p1505_p8 }
  0x66   : > { %p1228_p1 = por %p1227_p4, %p1226_p12 }
  0x67   : > { %p1222_p11 = pneg %p1221_p10 }
  0x69   : > { %p1229_p3 = pnand %p1228_p1, %p1222_p11 }
  0x6b   : > { %1232 = shalt.err (!%p1229_p3)
}
  0x6c   : > { %997 = dma.hbm_to_vmem [thread:$0]  (!%p1491_p6), %s1779_s2, 16, %s234_s28, [#allocation6]  }
  0x6d   : > { %s1233_s23 = scalar_lea.hbm %s1781_s4, 32 }
  0x6e   : > { %p1234_p13 = scmp.ne.s32.totalorder %s1781_s4, %s1233_s23  ;;  %p1240_p3 = scmp.lt.u32.totalorder %s1233_s23, %s1781_s4 }
  0x70   : > { %p1236_p0 = pnand %p1234_p13, %p1505_p8 }
  0x72   : > { %p1237_p1 = pneg %p1236_p0 }
  0x74   : > { %p1242_p2 = pnand %p1240_p3, %p1237_p1 }
  0x76   : > { %1245 = shalt.err (!%p1242_p2)
}
  0x77   : > { %s1246_s17 = scalar_lea.vmem %s258_s12, 32  ;;  %p1254_p10 = scmp.lt.s32.totalorder %s258_s12, %s258_s12 }
  0x78   : > { %p1247_p5 = scmp.ne.s32.totalorder %s258_s12, %s1246_s17  ;;  %p1255_p11 = scmp.lt.s32.totalorder %s1246_s17, %s1246_s17 }
  0x7a   : > { %p1249_p7 = pnand %p1247_p5, %p1505_p8  ;;  %p1256_p12 = por %p1255_p11, %p1254_p10 }
  0x7c   : > { %p1250_p9 = pneg %p1249_p7 }
  0x7e   : > { %p1257_p4 = pnand %p1256_p12, %p1250_p9 }
  0x80   : > { %1260 = shalt.err (!%p1257_p4)
}
  0x81   : > { %1003 = dma.hbm_to_vmem [thread:$0]  (!%p1491_p6), %s1781_s4, 32, %s258_s12, [#allocation9]  }
  0x82   : > { %s1408_s10 = smov [#allocation13]   ;;  %s1261_s21 = scalar_lea.hbm %s1783_s6, 16 }
  0x83   : > { %s281_s13 = sshll.u32 %s1408_s10, 4  ;;  %p1262_p13 = scmp.ne.s32.totalorder %s1783_s6, %s1261_s21  ;;  %s282_s13 = int_to_ptr.vmem [resolvable:$true] %s281_s13 }
  0x84   : > { %p1268_p3 = scmp.lt.u32.totalorder %s1261_s21, %s1783_s6 }
  0x85   : > { %p1264_p0 = pnand %p1262_p13, %p1505_p8 }
  0x87   : > { %p1265_p1 = pneg %p1264_p0 }
  0x89   : > { %p1270_p2 = pnand %p1268_p3, %p1265_p1 }
  0x8b   : > { %1273 = shalt.err (!%p1270_p2)
}
  0x8c   : > { %s1274_s12 = scalar_lea.vmem %s282_s13, 16  ;;  %s1281_s14 = scalar_lea.vmem %s282_s13, 32 }
  0x8d   : > { %p1275_p5 = scmp.ne.s32.totalorder %s282_s13, %s1274_s12  ;;  %p1282_p10 = scmp.lt.s32.totalorder %s282_s13, %s282_s13 }
  0x8e   : > { %p1283_p11 = scmp.lt.s32.totalorder %s1281_s14, %s1274_s12 }
  0x8f   : > { %p1277_p7 = pnand %p1275_p5, %p1505_p8 }
  0x90   : > { %p1284_p12 = por %p1283_p11, %p1282_p10 }
  0x91   : > { %p1278_p9 = pneg %p1277_p7 }
  0x93   : > { %p1285_p4 = pnand %p1284_p12, %p1278_p9 }
  0x95   : > { %1288 = shalt.err (!%p1285_p4)
}
  0x96   : > { %1009 = dma.hbm_to_vmem [thread:$0]  (!%p1491_p6), %s1783_s6, 16, %s282_s13, [#allocation12]  }
  0x97   : > { %s882_s19 = sadd.s32 4294967294, %s1397_s27   ;;  %s1629_s11 = sadd.s32 1, %s1397_s27  }
  0x98   : > { %s30_s17 = ssub.s32 %s1397_s27, %s1629_s11  ;;  %s33_s28 = sadd.s32 1, %s1393_s26 }
  0x99   : > { %p31_p8 = scmp.eq.s32.totalorder %s30_s17, 0  ;;  %p40_p13 = scmp.ne.s32.totalorder %s1393_s26, %s1389_s25 }
  0x9a   : > { %p41_p0 = scmp.eq.s32.totalorder %s1397_s27, 0  ;;  %p46_p1 = scmp.ne.s32.totalorder %s1389_s25, %s1385_s24 }
  0x9b   : > { %s1640_s18 = scalar_select %p31_p8, %s1393_s26, %s33_s28  }
  0x9c   : > { %p1642_p3 = por %p41_p0, %p40_p13  ;;  %p1794_p2 = scmp.eq.s32.totalorder %s1473_s30, 0 }
  0x9d   : > { %p196_p5 = scmp.eq.s32.totalorder %s1473_s30, 1  ;;  %p202_p7 = scmp.eq.s32.totalorder %s882_s19, 1 }
  0x9e   : > { %p1648_p6 = por %p1794_p2, %p46_p1  ;;  %p1024_p9 = scmp.lt.s32.totalorder %s1397_s27, 2 }
  0x9f   : > { %s292_s20 = sand.u32 1, %s1393_s26   ;;  %p1655_p10 = por %p196_p5, %p40_p13 }
  0xa0   : > { %p1659_p11 = por %p202_p7, %p46_p1  ;;  %s891_s1 = sshll.u32 %s292_s20, 3 }
  0xa1   : > { %s1796_s29 = scalar_select %p1655_p10, 1, 0 }
  0xa2   : > { %s1797_s21 = scalar_select %p1659_p11, 1, 0 }
  0xa3   : > { %s892_s22 = sshll.u32 %s1397_s27, 7  ;;  %s296_s14 = scalar_lea.vmem [#allocation2], %s891_s1 }
  0xa4   : > { %s1667_s12 = scalar_lea.hbm %s1777_s0, %s892_s22  ;;  %s303_s15 = sshll.u32 %s296_s14, 4  ;;  %s1669_s15 = int_to_ptr.vmem [resolvable:$true] %s303_s15 }
  0xa5   : > { %p1673_p12 = pnand %p1024_p9, %p1642_p3  ;;  %s293_s19 = scalar_lea.sflag [#allocation3], %s292_s20 }
  0xa6   : > { %s1289_s17 = scalar_lea.hbm %s1667_s12, 128  ;;  %s1294_s22 = scalar_lea.hbm %s1777_s0, 256 }
  0xa7   : > { %p1290_p4 = scmp.ne.s32.totalorder %s1667_s12, %s1289_s17  ;;  %p1291_p8 = pneg %p1673_p12 }
  0xa8   : > { %p1295_p1 = scmp.lt.u32.totalorder %s1667_s12, %s1777_s0  ;;  %p1296_p3 = scmp.lt.u32.totalorder %s1294_s22, %s1289_s17 }
  0xa9   : > { %p1292_p13 = pnand %p1291_p8, %p1290_p4  ;;  %p1298_p5 = scmp.lt.u32.totalorder %s1289_s17, %s1667_s12 }
  0xaa   : > { %p1297_p2 = por %p1296_p3, %p1295_p1 }
  0xab   : > { %p1293_p0 = pneg %p1292_p13 }
  0xac   : > { %p1299_p7 = por %p1298_p5, %p1297_p2 }
  0xae   : > { %p1300_p9 = pnand %p1299_p7, %p1293_p0 }
  0xb0   : > { %1303 = shalt.err (!%p1300_p9)
}
  0xb1   : > { %s1304_s20 = scalar_lea.vmem %s1669_s15, 128  ;;  %s1409_s9 = smov [#allocation2]  }
  0xb2   : > { %p1305_p4 = scmp.ne.s32.totalorder %s1669_s15, %s1304_s20  ;;  %s1309_s14 = sshll.u32 %s1409_s9, 4  ;;  %s1310_s14 = int_to_ptr.vmem [resolvable:$false] %s1309_s14 }
  0xb3   : > { %s1311_s28 = scalar_lea.vmem %s1310_s14, 256  ;;  %p1312_p10 = scmp.lt.s32.totalorder %s1669_s15, %s1310_s14 }
  0xb4   : > { %p1307_p13 = pnand %p1305_p4, %p1291_p8  ;;  %p1313_p1 = scmp.lt.s32.totalorder %s1311_s28, %s1304_s20 }
  0xb6   : > { %p1308_p11 = pneg %p1307_p13  ;;  %p1314_p3 = por %p1313_p1, %p1312_p10 }
  0xb8   : > { %p1315_p2 = pnand %p1314_p3, %p1308_p11 }
  0xba   : > { %1318 = shalt.err (!%p1315_p2)
}
  0xbb   : > { %1013 = dma.hbm_to_vmem [thread:$0]  (!%p1673_p12), %s1667_s12, 128, %s1669_s15, %s293_s19  }
  0xbc   : > { %p1799_p0 = scmp.ne.s32.totalorder %s1789_s8, 0 }
  0xbd   : > { %s1705_s17 = sand.u32 (!%p1799_p0), 1, %s1389_s25  }
  0xbe   : > { %312 = sbr.rel (%p1799_p0) target bundleno = 988 (0x3dc), region = 48  ;;  %s894_s1 = sshll.u32 (!%p1799_p0), %s1705_s17, 3 }
  0xbf   : > { %s315_s22 = scalar_lea.sflag (!%p1799_p0), [#allocation3], %s1705_s17  ;;  %s318_s10 = scalar_lea.vmem (!%p1799_p0), [#allocation2], %s894_s1 }
  0xc5   : > { %1364 = dma.done.wait (%p1648_p6), %s315_s22, 128  }
  0xc6   : > { %1366 = vsyncadd (%p1648_p6), %s315_s22, 4294967168  ;;  %p1800_p10 = scmp.eq.s32.totalorder %s1473_s30, 0 }
  0xc8   : > { %1368 = dma.done.wait (%p1800_p10), [#allocation6], 32   ;;  %p1801_p11 = pmov %p1800_p10 }
  0xc9   : > { %p1802_p12 = pmov %p1800_p10 }
  0xca   : > { %1370 = vsyncadd (%p1801_p11), [#allocation6], 4294967264 }
  0xcb   : > { %1372 = dma.done.wait (%p1802_p12), [#allocation9], 2080   ;;  %p1803_p8 = pmov %p1800_p10 }
  0xcd   : > { %1374 = vsyncadd (%p1803_p8), [#allocation9], 4294965216  ;;  %p1804_p5 = pmov %p1803_p8 }
  0xcf   : > { %1376 = dma.done.wait (%p1804_p5), [#allocation12], 2064   ;;  %p1805_p7 = pmov %p1804_p5 }
  0xd0   : > { %v374_v0 = vld [vmem:[%s318_s10] sm:$0xff]  ;;  %v1077_v2 = vld [vmem:[#allocation8] ss:$8 sps:$4 sm:$0xff]   ;;  %v1410_v16 = vmov 0   ;;  %v902_v30 = vld [vmem:[#allocation5] ss:$0 sm:$0xff]  ;;  %v422_v48 = vlaneseq }
  0xd1   : > { %1378 = vsyncadd (%p1805_p7), [#allocation12], 4294965232  ;;  %375 = vadd.xlane.f32.xlu0 %v374_v0  ;;  %v1075_v1 = vld [vmem:[#allocation8 + $0x4] ss:$8 sps:$4 sm:$0xff]   ;;  %v1078_v3 = vld [vmem:[#allocation8 + $0x14] ss:$8 sps:$4 sm:$0xff]   ;;  %544 = vmatprep.mubr.bf16.mxu0 %v1410_v16 }
  0xd2   : > { %512 = vmatprep.subr.bf16.mxu0 %v1075_v1  ;;  %v1080_v4 = vld [vmem:[#allocation8 + $0x10] ss:$8 sps:$4 sm:$0xff]   ;;  %v1081_v5 = vld [vmem:[#allocation8 + $0x24] ss:$8 sps:$4 sm:$0xff]   ;;  %v1083_v10 = vld [vmem:[#allocation8 + $0x20] ss:$8 sps:$4 sm:$0xff]  }
  0xd3   : > { %513 = vmatpush1.bf16.msra.mxu0 %v1077_v2  ;;  %v1084_v11 = vld [vmem:[#allocation8 + $0x34] ss:$8 sps:$4 sm:$0xff]   ;;  %v1086_v12 = vld [vmem:[#allocation8 + $0x30] ss:$8 sps:$4 sm:$0xff]   ;;  %v1087_v13 = vld [vmem:[#allocation8 + $0x44] ss:$8 sps:$4 sm:$0xff]  }
  0xd4   : > { %514 = vmatprep.subr.bf16.mxu0 %v1078_v3  ;;  %v1089_v14 = vld [vmem:[#allocation8 + $0x40] ss:$8 sps:$4 sm:$0xff]   ;;  %v1090_v15 = vld [vmem:[#allocation8 + $0x54] ss:$8 sps:$4 sm:$0xff]   ;;  %v1092_v17 = vld [vmem:[#allocation8 + $0x50] ss:$8 sps:$4 sm:$0xff]  }
  0xd5   : > { %v1093_v18 = vld [vmem:[#allocation8 + $0x64] ss:$8 sps:$4 sm:$0xff]   ;;  %v1095_v19 = vld [vmem:[#allocation8 + $0x60] ss:$8 sps:$4 sm:$0xff]   ;;  %v1096_v20 = vld [vmem:[#allocation8 + $0x74] ss:$8 sps:$4 sm:$0xff]  }
  0xd6   : > { %v1098_v21 = vld [vmem:[#allocation8 + $0x70] ss:$8 sps:$4 sm:$0xff]   ;;  %v1099_v22 = vld [vmem:[#allocation11 + $0x40] sm:$0xff]   ;;  %v903_v32 = vld [vmem:[#allocation7] ss:$0 sm:$0xff]  ;;  %v423_v49 = vshrl.u32 %v422_v48, 7 }
  0xd7   : > { %515 = vmatpush1.bf16.msra.mxu0 %v1080_v4  ;;  %v1100_v23 = vld [vmem:[#allocation11] sm:$0xff]   ;;  %v1101_v24 = vld [vmem:[#allocation11 + $0x48] sm:$0xff]   ;;  %941 = vmatprep.subr.bf16.mxu1 %v1099_v22  ;;  %v1103_v36 = vld [vmem:[#allocation11 + $0x50] sm:$0xff]   ;;  %s938_s8 = sshll.u32 %s1473_s30, 7  ;;  %s372_s13 = scalar_lea.vmem [#allocation14], %s894_s1 }
  0xd8   : > { %516 = vmatprep.subr.bf16.mxu0 %v1081_v5  ;;  %942 = vmatpush3.bf16.msra.mxu1 %v1100_v23  ;;  %v1102_v25 = vld [vmem:[#allocation11 + $0x8] sm:$0xff]   ;;  %v1104_v37 = vld [vmem:[#allocation11 + $0x10] sm:$0xff]   ;;  %v1105_v38 = vld [vmem:[#allocation11 + $0x58] sm:$0xff]   ;;  %v424_v50 = vsub.s32 0, %v423_v49  ;;  %v428_v52 = vsub.s32 1, %v423_v49  ;;  %s755_s12 = sshll.u32 %s372_s13, 4  ;;  %s1733_s19 = scalar_lea.hbm %s1784_s7, %s938_s8  ;;  %s1735_s12 = int_to_ptr.vmem [resolvable:$true] %s755_s12 }
  0xd9   : > { %943 = vmatprep.subr.bf16.mxu1 %v1101_v24  ;;  %v1106_v39 = vld [vmem:[#allocation11 + $0x18] sm:$0xff]   ;;  %v1107_v40 = vld [vmem:[#allocation11 + $0x60] sm:$0xff]   ;;  %v1109_v42 = vld [vmem:[#allocation11 + $0x68] sm:$0xff]   ;;  %s742_s23 = scalar_lea.sflag [#allocation4], %s1705_s17  ;;  %s1319_s30 = scalar_lea.vmem %s1735_s12, 128 }
  0xda   : > { %v1108_v41 = vld [vmem:[#allocation11 + $0x20] sm:$0xff]   ;;  %v1110_v43 = vld [vmem:[#allocation11 + $0x28] sm:$0xff]   ;;  %v1111_v44 = vld [vmem:[#allocation11 + $0x70] sm:$0xff]   ;;  %p1320_p6 = scmp.ne.s32.totalorder %s1735_s12, %s1319_s30  ;;  %p1806_p9 = scmp.ne.s32.totalorder %s1796_s29, 0 }
  0xdb   : > { %517 = vmatpush1.bf16.msra.mxu0 %v1083_v10  ;;  %v1112_v45 = vld [vmem:[#allocation11 + $0x30] sm:$0xff]   ;;  %v1113_v46 = vld [vmem:[#allocation11 + $0x78] sm:$0xff]   ;;  %v920_v10 = vld [vmem:[#allocation13] ss:$0 sm:$0xff]  ;;  %s1411_s20 = smov [#allocation14]  }
  0xdc   : > { %518 = vmatprep.subr.bf16.mxu0 %v1084_v11  ;;  %944 = vmatpush3.bf16.msra.mxu1 %v1102_v25  ;;  %v1114_v47 = vld [vmem:[#allocation11 + $0x38] sm:$0xff]   ;;  %p1321_p4 = pnand %p1320_p6, %p1806_p9  ;;  %s1323_s9 = sshll.u32 %s1411_s20, 4  ;;  %s1324_s9 = int_to_ptr.vmem [resolvable:$false] %s1323_s9 }
  0xdd   : > { %945 = vmatprep.subr.bf16.mxu1 %v1103_v36  ;;  %v420_v51 = vld [vmem:[#allocation10] sm:$0x3]  ;;  %s1325_s14 = scalar_lea.vmem %s1324_s9, 256  ;;  %p1326_p1 = scmp.lt.s32.totalorder %s1735_s12, %s1324_s9 }
  0xde   : > { %v425_v53 = vrot.slane %v420_v51, %v424_v50  ;;  %v429_v54 = vrot.slane %v420_v51, %v428_v52  ;;  %p1322_p13 = pneg %p1321_p4  ;;  %p1327_p3 = scmp.lt.s32.totalorder %s1325_s14, %s1319_s30 }
  0xdf   : > { %519 = vmatpush1.bf16.msra.mxu0 %v1086_v12 }
  0xe0   : > { %520 = vmatprep.subr.bf16.mxu0 %v1087_v13  ;;  %946 = vmatpush3.bf16.msra.mxu1 %v1104_v37  ;;  %p1328_p2 = por %p1327_p3, %p1326_p1 }
  0xe1   : > { %947 = vmatprep.subr.bf16.mxu1 %v1105_v38 }
  0xe2   : > { %p1329_p0 = pnand %p1328_p2, %p1322_p13 }
  0xe3   : > { %521 = vmatpush1.bf16.msra.mxu0 %v1089_v14 }
  0xe4   : > { %522 = vmatprep.subr.bf16.mxu0 %v1090_v15  ;;  %948 = vmatpush3.bf16.msra.mxu1 %v1106_v39 }
  0xe5   : > { %949 = vmatprep.subr.bf16.mxu1 %v1107_v40 }
  0xe7   : > { %523 = vmatpush1.bf16.msra.mxu0 %v1092_v17 }
  0xe8   : > { %524 = vmatprep.subr.bf16.mxu0 %v1093_v18  ;;  %950 = vmatpush3.bf16.msra.mxu1 %v1108_v41 }
  0xe9   : > { %951 = vmatprep.subr.bf16.mxu1 %v1109_v42 }
  0xeb   : > { %525 = vmatpush1.bf16.msra.mxu0 %v1095_v19 }
  0xec   : > { %526 = vmatprep.subr.bf16.mxu0 %v1096_v20  ;;  %952 = vmatpush3.bf16.msra.mxu1 %v1110_v43 }
  0xed   : > { %953 = vmatprep.subr.bf16.mxu1 %v1111_v44 }
  0xef   : > { %527 = vmatpush1.bf16.msra.mxu0 %v1098_v21 }
  0xf0   : > { %954 = vmatpush3.bf16.msra.mxu1 %v1112_v45 }
  0xf1   : > { %955 = vmatprep.subr.bf16.mxu1 %v1113_v46 }
  0xf4   : > { %956 = vmatpush3.bf16.msra.mxu1 %v1114_v47 }
 0x15e   : > { %v376_v6 = vpop.xlane.xlu0 %375 }
 0x15f   : > { %v378_v7 = vmul.f32 0.0078125, %v376_v6 }
 0x161   : > { %v379_v8 = vsub.f32 %v374_v0, %v378_v7 }
 0x163   : > { %v380_v9 = vmul.f32 %v379_v8, %v379_v8 }
 0x165   : > { %381 = vadd.xlane.f32.xlu0 %v380_v9 }
 0x1f2   : > { %v382_v26 = vpop.xlane.xlu0 %381 }
 0x1f3   : > { %v383_v27 = vmul.f32 0.0078125, %v382_v26 }
 0x1f5   : > { %v384_v28 = vadd.f32 1e-05, %v383_v27 }
 0x1f7   : > { %1115 = vrsqrt.f32 %v384_v28 }
 0x201   : > { %v1116_v29 = vpop.eup %1115 }
 0x202   : > { %v386_v31 = vmul.f32 %v1116_v29, %v379_v8 }
 0x204   : > { %v394_v33 = vmul.f32 %v902_v30, %v386_v31 }
 0x206   : > { %v402_v34 = vadd.f32 %v903_v32, %v394_v33 }
 0x208   : > { %v403_v35 = vpack.c.bf16 %v402_v34, %v402_v34 }
 0x20a   : > { %545 = vmatmul.mubr.bf16.vlgmr.msra.gmra.mrb[0].mxu0 %v403_v35 }
 0x2dd   : > { %v546_v55 = vpop.f32.mrb[0].mxu0 }
 0x2de   : > { %v547_v56 = vadd.f32 %v546_v55, %v425_v53  ;;  %v548_v57 = vpop.f32.mrb[1].mxu0 }
 0x2df   : > { %v549_v58 = vadd.f32 %v548_v57, %v429_v54  ;;  %v550_v59 = vpop.f32.mrb[2].mxu0 }
 0x2e0   : > { %v555_v60 = vmul.f32 0.70710677, %v547_v56  ;;  %v551_v61 = vpop.f32.mrb[3].mxu0  ;;  %v553_v1 = vmul.f32 0.5, %v547_v56 }
 0x2e1   : > { %v556_v62 = vmul.f32 0.70710677, %v549_v58  ;;  %v554_v3 = vmul.f32 0.5, %v549_v58 }
 0x2e2   : > { %1117 = verf.f32 %v555_v60 }
 0x2e3   : > { %1119 = verf.f32 %v556_v62 }
 0x2ec   : > { %v1118_v63 = vpop.eup %1117 }
 0x2ed   : > { %v1120_v0 = vpop.eup %1119  ;;  %v559_v2 = vadd.f32 1.0, %v1118_v63 }
 0x2ee   : > { %v560_v4 = vadd.f32 1.0, %v1120_v0 }
 0x2ef   : > { %v561_v5 = vmul.f32 %v559_v2, %v553_v1 }
 0x2f0   : > { %v562_v6 = vmul.f32 %v560_v4, %v554_v3 }
 0x2f1   : > { %v563_v8 = vpack.c.bf16 %v561_v5, %v561_v5 }
 0x2f2   : > { %v564_v7 = vpack.c.bf16 %v562_v6, %v562_v6 }
 0x2f4   : > { %732 = vmatprep.mubr.bf16.mxu1 %v564_v7 }
 0x2f5   : > { %733 = vmatmul.mubr.bf16.vlgmr.msra.gmra.mrb[0].mxu1 %v563_v8 }
 0x3c8   : > { %v957_v9 = vpop.f32.mrb[0].mxu1 }
 0x3c9   : > { %v958_v11 = vpop.f32.mrb[1].mxu1 }
 0x3ca   : > { %v959_v12 = vadd.f32 %v958_v11, %v957_v9  ;;  %v960_v13 = vpop.f32.mrb[2].mxu1 }
 0x3cb   : > { %v961_v14 = vpop.f32.mrb[3].mxu1 }
 0x3cc   : > { %v735_v15 = vadd.f32 %v959_v12, %v920_v10 }
 0x3ce   : > { %740 = vst [vmem:[%s372_s13] sm:$0xff] %v735_v15 }
 0x3cf   : > { %1332 = shalt.err (!%p1329_p0)
}
 0x3d0   : > { %s1333_s28 = scalar_lea.hbm %s1733_s19, 128  ;;  %s1337_s22 = scalar_lea.hbm %s1784_s7, 256 }
 0x3d1   : > { %p1334_p10 = scmp.ne.s32.totalorder %s1733_s19, %s1333_s28  ;;  %p1338_p8 = scmp.lt.u32.totalorder %s1733_s19, %s1784_s7 }
 0x3d2   : > { %p1339_p5 = scmp.lt.u32.totalorder %s1337_s22, %s1333_s28  ;;  %p1341_p6 = scmp.lt.u32.totalorder %s1333_s28, %s1733_s19 }
 0x3d3   : > { %p1335_p11 = pnand %p1334_p10, %p1806_p9 }
 0x3d4   : > { %p1340_p7 = por %p1339_p5, %p1338_p8 }
 0x3d5   : > { %p1336_p12 = pneg %p1335_p11 }
 0x3d6   : > { %p1342_p4 = por %p1341_p6, %p1340_p7 }
 0x3d8   : > { %p1343_p13 = pnand %p1342_p4, %p1336_p12 }
 0x3da   : > { %1346 = shalt.err (!%p1343_p13)
}
 0x3db   : > { %989 = dma.vmem_to_hbm [thread:$0]  (%p1806_p9), %s1735_s12, 128, %s1733_s19, %s742_s23  }
 0x3dc PF: > { %s767_s13 = sand.u32 1, %s1385_s24   ;;  %p1807_p1 = scmp.ne.s32.totalorder %s1797_s21, 0 }
 0x3dd   : > { %p1808_p3 = scmp.ge.s32.totalorder %s1397_s27, 2  ;;  %s768_s15 = scalar_lea.sflag [#allocation4], %s767_s13 }
 0x3df   : > { %p1015_p2 = pnand %p1808_p3, %p1807_p1 }
 0x3e1   : > { %1380 = dma.done.wait (!%p1015_p2), %s768_s15, 128  }
 0x3e2   : > { %1382 = vsyncadd (!%p1015_p2), %s768_s15, 4294967168  ;;  %p23_p0 = scmp.ge.s32.totalorder %s1629_s11, 4   ;;  %s1809_s24 = smov %s1389_s25 }
 0x3e3   : > { %s1810_s25 = smov %s1393_s26  ;;  %s1811_s26 = smov %s1640_s18 }
 0x3e4   : > { %s1812_s27 = smov %s1629_s11  ;;  %25 = sbr.rel (!%p23_p0) target bundleno = 10 (0xa), region = 117 }
 0x3eb   :  { %773 = vsyncpa [#allocation3], 1 }
 0x3ec   :  { %775 = vsyncpa [#allocation3 + $0x1], 1 }
 0x3ed   :  { %776 = vsyncpa [#allocation6], 1 }
 0x3ee   :  { %777 = vsyncpa [#allocation9], 1 }
 0x3ef   :  { %778 = vsyncpa [#allocation12], 1 }
 0x3f0   :  { %779 = vsyncpa [#allocation4], 1 }
 0x3f1   :  { %781 = vsyncpa [#allocation4 + $0x1], 1 }

</bundles_post_ra>
